<compile_context>
chip_gen: v6e
topology: v6e:2x2x1
jax: 0.10.0
libtpu: 0.0.40
codegen_flags: <defaults>
</compile_context>

<pallas_src>
import jax
import jax.numpy as jnp
from jax.experimental import pallas as pl
from jax.experimental.pallas import tpu as pltpu

_SQUEEZED = pl.Squeezed() if hasattr(pl, "Squeezed") else None


def _unfold_embed_kernel(xu_ref, w_ref, b_ref, o_ref):
    # xu_ref: (TS, k) windows   w_ref: (k, H)   b_ref: (1, H)   o_ref: (TS, H)
    acc = jnp.dot(xu_ref[...], w_ref[...], preferred_element_type=jnp.float32)
    o_ref[...] = (acc + b_ref[...]).astype(o_ref.dtype)


def _round_up(v: int, m: int) -> int:
    return (v + m - 1) // m * m


def unfold_embed_forward(x, weight, bias, *, d_kernel: int, seq_tile: int = 512):
    """x: (B, L); weight: (H, d_kernel) (nn.Linear layout); bias: (H,). Returns (B, L, H)."""
    assert d_kernel % 2 == 1, "kernel size must be odd"
    B, L = x.shape
    H, k = weight.shape
    assert k == d_kernel
    half = k // 2

    # Sequence tile: multiple of 8 sublanes, capped so double-buffered (TS, H) blocks stay
    # comfortably inside scoped VMEM on every TPU generation even at large H.
    ts = max(8, min(seq_tile, _round_up(L, 8)))
    n_s = pl.cdiv(L, ts)
    l_r = n_s * ts                                    # rounded-up number of output rows

    # Pad: k//2 each side (module semantics) + extra zeros so all l_r rows are valid.
    x_pad = jnp.pad(x, ((0, 0), (half, half + (l_r - L))))
    # Sliding windows (B, l_r, k): window t is x_pad[:, t : t + k].
    x_unf = jnp.stack([x_pad[:, j:j + l_r] for j in range(k)], axis=-1)

    w_t = weight.T.astype(jnp.float32)                # (k, H)
    b_row = bias.reshape(1, H).astype(jnp.float32)    # (1, H)

    out = pl.pallas_call(
        _unfold_embed_kernel,
        out_shape=jax.ShapeDtypeStruct((B, l_r, H), x.dtype),
        grid=(B, n_s),
        in_specs=[
            pl.BlockSpec((_SQUEEZED, ts, k), lambda b, s: (b, s, 0)),  # windows per seq-tile
            pl.BlockSpec((k, H), lambda b, s: (0, 0)),                 # weight (constant idx)
            pl.BlockSpec((1, H), lambda b, s: (0, 0)),                 # bias   (constant idx)
        ],
        out_specs=pl.BlockSpec((_SQUEEZED, ts, H), lambda b, s: (b, s, 0)),
        compiler_params=pltpu.CompilerParams(
            dimension_semantics=("parallel", "parallel"),
            vmem_limit_bytes=32 * 1024 * 1024,
        ),
    )(x_unf, w_t, b_row)

    return out[:, :L, :]


if __name__ == "__main__":
    key = jax.random.PRNGKey(0)
    B, L = 2, 16                  # (batch, seq)
    d_kernel, hidden = 5, 128     # odd kernel; hidden chosen lane-dense (multiple of 128)

    kx, kw, kb = jax.random.split(key, 3)
    x = jax.random.normal(kx, (B, L), dtype=jnp.float32)
    weight = 0.1 * jax.random.normal(kw, (hidden, d_kernel), dtype=jnp.float32)
    bias = 0.1 * jax.random.normal(kb, (hidden,), dtype=jnp.float32)

    out = unfold_embed_forward(x, weight, bias, d_kernel=d_kernel)
    jax.block_until_ready(out)

    # Pure-JAX reference mirroring the PyTorch forward: pad -> unfold -> linear.
    half = d_kernel // 2
    x_ref_pad = jnp.pad(x, ((0, 0), (half, half)))
    x_ref_unf = jnp.stack([x_ref_pad[:, j:j + L] for j in range(d_kernel)], axis=-1)
    expected = jnp.einsum("blk,hk->blh", x_ref_unf, weight, precision="highest") + bias

    assert out.shape == (B, L, hidden)
    assert jnp.allclose(out, expected, atol=1e-4, rtol=1e-4), "mismatch vs reference"
    print("KERNEL_OK")
</pallas_src>

<mosaic_0001>
module attributes {stable_mosaic.version = 11 : i64} {
  func.func @_unfold_embed_kernel(%arg0: i32, %arg1: i32, %arg2: memref<1x16x5xf32, #tpu.memory_space<vmem>>, %arg3: memref<5x128xf32, #tpu.memory_space<vmem>>, %arg4: memref<1x128xf32, #tpu.memory_space<vmem>>, %arg5: memref<1x16x128xf32, #tpu.memory_space<vmem>>) attributes {dimension_semantics = [#tpu.dimension_semantics<parallel>, #tpu.dimension_semantics<parallel>], iteration_bounds = array<i64: 2, 1>, scalar_prefetch = 0 : i64, scratch_operands = 0 : i64, tpu.core_type = #tpu.core_type<tc>, window_params = [{transform_indices = @transform_0, window_bounds = array<i64: 1, 16, 5>}, {pipeline_mode = #tpu.pipeline_mode<synchronous>, transform_indices = @transform_1, window_bounds = array<i64: 5, 128>}, {pipeline_mode = #tpu.pipeline_mode<synchronous>, transform_indices = @transform_2, window_bounds = array<i64: 1, 128>}, {transform_indices = @transform_3, window_bounds = array<i64: 1, 16, 128>}]} {
    %c0 = arith.constant 0 : index
    %c0_0 = arith.constant 0 : index
    %c0_1 = arith.constant 0 : index
    %0 = vector.load %arg2[%c0, %c0_0, %c0_1] : memref<1x16x5xf32, #tpu.memory_space<vmem>>, vector<1x16x5xf32>
    %1 = vector.shape_cast %0 : vector<1x16x5xf32> to vector<16x5xf32>
    %c0_2 = arith.constant 0 : index
    %c0_3 = arith.constant 0 : index
    %2 = vector.load %arg3[%c0_2, %c0_3] : memref<5x128xf32, #tpu.memory_space<vmem>>, vector<5x128xf32>
    %cst = arith.constant dense<0.000000e+00> : vector<16x128xf32>
    %3 = tpu.matmul %1, %2, %cst {dimension_numbers = #tpu.dot_dimension_numbers<[1], [0], [0], [1], [0, 0, 1, 1], [], []>} : vector<16x5xf32>, vector<5x128xf32>, vector<16x128xf32> -> vector<16x128xf32>
    %c0_4 = arith.constant 0 : index
    %c0_5 = arith.constant 0 : index
    %4 = vector.load %arg4[%c0_4, %c0_5] : memref<1x128xf32, #tpu.memory_space<vmem>>, vector<1x128xf32>
    %5 = vector.broadcast %4 : vector<1x128xf32> to vector<16x128xf32>
    %6 = arith.addf %3, %5 : vector<16x128xf32>
    %c0_6 = arith.constant 0 : index
    %c0_7 = arith.constant 0 : index
    %c0_8 = arith.constant 0 : index
    %7 = vector.load %arg5[%c0_6, %c0_7, %c0_8] : memref<1x16x128xf32, #tpu.memory_space<vmem>>, vector<1x16x128xf32>
    %8 = vector.shape_cast %7 : vector<1x16x128xf32> to vector<16x128xf32>
    %9 = vector.shape_cast %6 : vector<16x128xf32> to vector<1x16x128xf32>
    tpu.vector_store %arg5[%c0_6, %c0_7, %c0_8], %9 {strides = array<i32>} : memref<1x16x128xf32, #tpu.memory_space<vmem>>, vector<1x16x128xf32>,
    return
  }
  func.func @transform_0(%arg0: i32, %arg1: i32) -> (i32, i32, i32) {
    %c0_i32 = arith.constant 0 : i32
    %c0_i32_0 = arith.constant 0 : i32
    return %arg0, %arg1, %c0_i32 : i32, i32, i32
  }
  func.func @transform_1(%arg0: i32, %arg1: i32) -> (i32, i32) {
    %c0_i32 = arith.constant 0 : i32
    %c0_i32_0 = arith.constant 0 : i32
    %c0_i32_1 = arith.constant 0 : i32
    return %c0_i32, %c0_i32_0 : i32, i32
  }
  func.func @transform_2(%arg0: i32, %arg1: i32) -> (i32, i32) {
    %c0_i32 = arith.constant 0 : i32
    %c0_i32_0 = arith.constant 0 : i32
    %c0_i32_1 = arith.constant 0 : i32
    return %c0_i32, %c0_i32_0 : i32, i32
  }
  func.func @transform_3(%arg0: i32, %arg1: i32) -> (i32, i32, i32) {
    %c0_i32 = arith.constant 0 : i32
    %c0_i32_0 = arith.constant 0 : i32
    return %arg0, %arg1, %c0_i32 : i32, i32, i32
  }
}

</mosaic_0001>

<bundles_post_ra>
// kernel: tpu_custom_call.1
= control target key start
LH: loop header
LB: loop body
LE: loop exit
PB: predicated region body
PF: predicated region fallthrough
CT: control target
= control target key end

     0   :  { %8 = vsyncpa [#allocation3], 0  ;;  %s698_s0 = inlined_call_operand.vmem [shape: f32[2,16,5], index: 0, kind: input, shape index: {}]   ;;  %s699_s1 = inlined_call_operand.vmem [shape: f32[5,128], index: 1, kind: input, shape index: {}]   ;;  %s700_s2 = inlined_call_operand.vmem [shape: f32[1,128], index: 2, kind: input, shape index: {}]   ;;  %s701_s3 = inlined_call_operand.hbm [shape: f32[2,16,128], index: 3, kind: output, shape index: {}]  }
   0x1   :  { %10 = vsyncpa [#allocation3 + $0x1], 0  ;;  %s578_s12 = smov 0   ;;  %s580_s13 = smov 0  }
   0x2   :  { %s582_s14 = smov 0   ;;  %s584_s15 = smov 0  }
   0x3   :  { %s586_s16 = smov 0   ;;  %s588_s17 = smov 0  }
   0x4 LB: > { %s393_s18 = sadd.s32 4294967295, %s553_s17   ;;  %s394_s19 = sadd.s32 4294967294, %s553_s17   ;;  %s553_s17 = sphi %s588_s17, %s16_s17   ;;  %s549_s16 = sphi %s586_s16, %s708_s16   ;;  %s545_s15 = sphi %s584_s15, %s707_s15   ;;  %s541_s14 = sphi %s582_s14, %s706_s14   ;;  %s537_s13 = sphi %s580_s13, %s705_s13   ;;  %s533_s12 = sphi %s578_s12, %s704_s12  }
   0x5   : > { %s28_s20 = sadd.s32 1, %s549_s16  ;;  %s107_s21 = sadd.s32 1, %s541_s14 }
   0x6   : > { %p30_p0 = scmp.ge.s32.totalorder %s28_s20, 2  ;;  %p117_p1 = scmp.ne.s32.totalorder %s541_s14, %s537_s13 }
   0x7   : > { %p118_p2 = scmp.eq.s32.totalorder %s393_s18, 1  ;;  %p123_p3 = scmp.ne.s32.totalorder %s537_s13, %s533_s12 }
   0x8   : > { %s710_s20 = smov (%p30_p0, %s28_s20), 0  ;;  %p124_p5 = scmp.eq.s32.totalorder %s394_s19, 1 }
   0x9   : > { %p618_p4 = por %p118_p2, %p117_p1  ;;  %s102_s23 = ssub.s32 %s549_s16, %s710_s20 }
   0xa   : > { %p397_p6 = scmp.ge.s32.totalorder %s553_s17, 1  ;;  %p105_p7 = scmp.eq.s32.totalorder %s102_s23, 0 }
   0xb   : > { %p625_p8 = por %p124_p5, %p123_p3  ;;  %p161_p9 = scmp.lt.s32.totalorder %s553_s17, 3 }
   0xc   : > { %s631_s25 = scalar_select %p105_p7, %s541_s14, %s107_s21  }
   0xd   : > { %p162_p10 = pnand %p397_p6, %p161_p9 }
   0xe   : > { %p190_p11 = scmp.lt.s32.totalorder (!%p162_p10), %s545_s15, 1  ;;  %s186_s6 = sand.u32 (!%p162_p10), 1, %s537_s13  }
   0xf   : > { %165 = sbr.rel (%p162_p10) target bundleno = 237 (0xed), region = 32  ;;  %s398_s7 = sshll.u32 (!%p162_p10), %s186_s6, 4 }
  0x10   : > { %s188_s10 = scalar_lea.vmem (!%p162_p10), [#allocation2], %s398_s7  ;;  %s411_s18 = sshll.u32 (!%p162_p10), %s545_s15, 8 }
  0x11   : > { %s314_s11 = sshll.u32 (!%p162_p10), %s188_s10, 4  ;;  %s651_s23 = scalar_lea.hbm (!%p162_p10), %s701_s3, %s411_s18  ;;  %s646_s11 = int_to_ptr.vmem [resolvable:$true] %s314_s11 }
  0x12   : > { %s653_s26 = scalar_lea.sflag (!%p162_p10), [#allocation3], %s186_s6  ;;  %s477_s27 = scalar_lea.vmem (!%p162_p10), %s646_s11, 256 }
  0x13   : > { %p478_p12 = scmp.ne.s32.totalorder (!%p162_p10), %s646_s11, %s477_s27 }
  0x14   : > { %v202_v0 = vld [vmem:[%s699_s1] sm:$0x1f]  ;;  %vm217_vm0 = vcmask 1044480   ;;  %s191_s28 = scalar_select %p190_p11, %s545_s15, 1  ;;  %vm210_vm1 = vcmask 39936  }
  0x15   : > { %415 = vmatprep.subr.msk.mxu0 %vm217_vm0, %v202_v0  ;;  %v401_v3 = vld [vmem:[%s700_s2] ss:$0 sm:$0xff]  ;;  %p479_p13 = pnand %p478_p12, %p618_p4  ;;  %s555_s15 = smov [#allocation2]  }
  0x16   : > { %416 = vmatpush3.msk.msra.mxu0 %vm217_vm0, %v202_v0  ;;  %s410_s29 = sshll.u32 %s191_s28, 4  ;;  %s481_s28 = sshll.u32 %s555_s15, 4  ;;  %s482_s28 = int_to_ptr.vmem [resolvable:$false] %s481_s28 }
  0x17   : > { %s197_s5 = scalar_lea.vmem %s698_s0, %s410_s29  ;;  %p480_p0 = pneg %p479_p13 }
  0x18   : > { %v200_v1 = vld [vmem:[%s197_s5] sm:$0xff]  ;;  %v201_v2 = vld [vmem:[%s197_s5 + $0x8] sm:$0xff]  ;;  %s483_s29 = scalar_lea.vmem %s482_s28, 512  ;;  %p484_p1 = scmp.lt.s32.totalorder %s646_s11, %s482_s28 }
  0x19   : > { %417 = vmatprep.mubr.msk.f32.mxu0 %vm210_vm1, %v200_v1  ;;  %p485_p2 = scmp.lt.s32.totalorder %s483_s29, %s477_s27 }
  0x1a   : > { %418 = vmatmul.mubr.msk.f32.vlgmr.msra.gmra.mxu0 %vm210_vm1, %v201_v2 }
  0x1b   : > { %p486_p3 = por %p485_p2, %p484_p1 }
  0x1d   : > { %p487_p5 = pnand %p486_p3, %p480_p0 }
  0xda   : > { %v419_v4 = vpop.f32.mrf.mxu0 }
  0xdb   : > { %v293_v5 = vadd.f32 %v419_v4, %v401_v3 }
  0xdc   : > { %v287_v6 = vpop.f32.mrf.mxu0 }
  0xdd   : > { %297 = vst [vmem:[%s188_s10 + $0x8] sm:$0xff] %v293_v5  ;;  %v288_v7 = vadd.f32 %v401_v3, %v287_v6 }
  0xdf   : > { %296 = vst [vmem:[%s188_s10] sm:$0xff] %v288_v7 }
  0xe0   : > { %490 = shalt.err (!%p487_p5)
}
  0xe1   : > { %s491_s30 = scalar_lea.hbm %s651_s23, 256  ;;  %s495_s6 = scalar_lea.hbm %s701_s3, 512 }
  0xe2   : > { %p492_p6 = scmp.ne.s32.totalorder %s651_s23, %s491_s30  ;;  %p496_p10 = scmp.lt.s32.totalorder %s651_s23, %s701_s3 }
  0xe3   : > { %p497_p11 = scmp.lt.s32.totalorder %s495_s6, %s491_s30 }
  0xe4   : > { %p493_p7 = pnand %p492_p6, %p618_p4 }
  0xe5   : > { %p498_p12 = por %p497_p11, %p496_p10 }
  0xe6   : > { %p494_p9 = pneg %p493_p7 }
  0xe8   : > { %p499_p13 = pnand %p498_p12, %p494_p9 }
  0xea   : > { %502 = shalt.err (!%p499_p13)
}
  0xeb   : > { %s556_s9 = smov 128   ;;  %s557_s10 = smov 8  }
  0xec   : > { %420 = dma.vmem_to_hbm [thread:$0]  (%p618_p4), %s646_s11, 256, %s651_s23, %s653_s26, %s556_s9, %s556_s9, %s557_s10  }
  0xed PF: > { %p426_p0 = scmp.ge.s32.totalorder %s553_s17, 2  ;;  %s329_s18 = sand.u32 1, %s533_s12  }
  0xee   : > { %s330_s19 = scalar_lea.sflag [#allocation3], %s329_s18 }
  0xef   : > { %p423_p1 = pnand %p426_p0, %p625_p8 }
  0xf1   : > { %p424_p2 = pneg %p423_p1 }
  0xf3   : > { %528 = dma.done.wait (%p424_p2), %s330_s19, 256  }
  0xf4   : > { %530 = vsyncadd (%p424_p2), %s330_s19, 4294967040  ;;  %s16_s17 = sadd.s32 1, %s553_s17   ;;  %s704_s12 = smov %s537_s13 }
  0xf5   : > { %p13_p3 = scmp.ge.s32.totalorder %s16_s17, 4   ;;  %s705_s13 = smov %s541_s14 }
  0xf6   : > { %s706_s14 = smov %s631_s25  ;;  %s707_s15 = smov %s549_s16 }
  0xf7   : > { %s708_s16 = smov %s710_s20  ;;  %15 = sbr.rel (!%p13_p3) target bundleno = 4 (0x4), region = 67 }
  0xfc   :  { %335 = vsyncpa [#allocation3], 1 }
  0xfd   :  { %337 = vsyncpa [#allocation3 + $0x1], 1 }

</bundles_post_ra>
